<compile_context>
chip_gen: v6e
topology: v6e:2x2x1
jax: 0.10.0
libtpu: 0.0.40
codegen_flags: <defaults>
</compile_context>

<pallas_src>
import functools

import jax
import jax.numpy as jnp
from jax.experimental import pallas as pl
from jax.experimental.pallas import tpu as pltpu

LANES = 128
_SPLIT_THRESHOLD_BYTES = 512 * 1024   # above this, split across the 2 TCs (v7x)
_RAGGED_CHUNK_BYTES = 256 * 1024      # conservative: 1-D blocks may be sublane-padded in VMEM

# Older jax releases may not export the enum; the plain string works everywhere.
_CORE_PARALLEL = getattr(pltpu, "CORE_PARALLEL", "parallel")


def _h_swish_kernel(x_ref, o_ref):
    x = x_ref[...]
    xf = x.astype(jnp.float32)
    # relu6(x + 3) / 6  ->  clamp(x + 3, 0, 6) * (1/6)
    hsig = jnp.clip(xf + 3.0, 0.0, 6.0) * (1.0 / 6.0)
    o_ref[...] = (xf * hsig).astype(o_ref.dtype)


def _round_up(n, m):
    return -(-n // m) * m


@functools.lru_cache(maxsize=1)
def _chip_config():
    """Generation-dependent tiling / parallelism knobs."""
    try:
        kind = jax.devices()[0].device_kind.lower()
    except Exception:
        kind = ""
    tile_bytes = 2 * 1024 * 1024      # v5e / unknown: stay well under the 16 MiB scoped VMEM
    multi_core = False
    core_parallel = False
    if "v7" in kind:
        # 2 TensorCores/chip, ~3.2 TB/s HBM: bigger tiles amortize per-step overhead;
        # 2 bufs x (in + out) x 4 MiB = 16 MiB < 32 MiB default scoped VMEM.
        tile_bytes = 4 * 1024 * 1024
        multi_core = True
        core_parallel = True
    elif "v6" in kind:
        tile_bytes = 4 * 1024 * 1024  # 16 MiB double-buffered < 32 MiB default
    elif "v4" in kind or "v5p" in kind:
        multi_core = True             # megacore: plain "parallel" shards across TCs
    return {"tile_bytes": tile_bytes, "multi_core": multi_core,
            "core_parallel": core_parallel}


def _pallas_elementwise(x_arr, block_shape, grid, cfg, donate_input):
    itemsize = jnp.dtype(x_arr.dtype).itemsize
    cost = pl.CostEstimate(flops=5 * x_arr.size,
                           transcendentals=0,
                           bytes_accessed=2 * x_arr.size * itemsize)
    if x_arr.ndim == 2:
        index_map = lambda i: (i, 0)
    else:
        index_map = lambda i: (i,)

    kwargs = {}
    if donate_input:
        # Matches PyTorch's inplace=True: alias the output onto the input buffer.
        kwargs["input_output_aliases"] = {0: 0}

    def build(sem):
        return pl.pallas_call(
            _h_swish_kernel,
            out_shape=jax.ShapeDtypeStruct(x_arr.shape, x_arr.dtype),
            grid_spec=pltpu.PrefetchScalarGridSpec(
                num_scalar_prefetch=0,
                grid=grid,
                in_specs=[pl.BlockSpec(block_shape, index_map)],
                out_specs=pl.BlockSpec(block_shape, index_map),
            ),
            compiler_params=pltpu.CompilerParams(dimension_semantics=(sem,)),
            cost_estimate=cost,
            **kwargs,
        )

    sem = _CORE_PARALLEL if cfg["core_parallel"] else "parallel"
    try:
        return build(sem)(x_arr)
    except Exception:
        if sem == "parallel":
            raise
        # CORE_PARALLEL rejected on this chip / jax build -> plain parallel grid.
        return build("parallel")(x_arr)


def _choose_tile_rows(n_rows, itemsize, cfg):
    # Native packed vreg sublane tile: f32 -> 8, bf16 -> 16, int8/fp8 -> 32.
    sublane = max(8, 32 // itemsize)
    # Keep the per-step input DMA at ~tile_bytes regardless of dtype.
    target = max(sublane, cfg["tile_bytes"] // (LANES * itemsize))
    target = _round_up(target, sublane)
    if n_rows > target:
        return target
    # Whole array fits in one tile. A forced 2-way split only pays off on
    # multi-TensorCore chips (both cores stream); on 1-TC v5e/v6e the grid is
    # a serial loop, so keep a single full-array block there.
    if (cfg["multi_core"]
            and n_rows * LANES * itemsize > _SPLIT_THRESHOLD_BYTES
            and n_rows >= 2 * sublane):
        return _round_up(-(-n_rows // 2), sublane)
    return n_rows  # single block equal to the full array dim (always legal)


def _h_swish_2d(x2d, cfg, donate_input):
    n_rows, lanes = x2d.shape
    itemsize = jnp.dtype(x2d.dtype).itemsize
    tile_rows = _choose_tile_rows(n_rows, itemsize, cfg)
    grid = (pl.cdiv(n_rows, tile_rows),)
    return _pallas_elementwise(x2d, (tile_rows, lanes), grid, cfg, donate_input)


def _h_swish_flat(flat, cfg, donate_input):
    # Ragged fallback (size % 128 != 0): run directly on the flat 1-D array.
    # The last (partial) block is handled by Pallas's out-of-bounds store
    # masking (out-of-bounds reads are garbage but h_swish of garbage is
    # discarded), so there is no jnp.pad / [:total] slice -- a single read
    # pass and a single write pass over HBM.
    total = flat.shape[0]
    itemsize = jnp.dtype(flat.dtype).itemsize
    chunk_bytes = min(cfg["tile_bytes"], _RAGGED_CHUNK_BYTES)
    chunk = max(1024, (chunk_bytes // itemsize) // 1024 * 1024)  # 8*128-aligned
    if total <= chunk:
        chunk = total  # single block equal to the full array dim (always legal)
    grid = (pl.cdiv(total, chunk),)
    return _pallas_elementwise(flat, (chunk,), grid, cfg, donate_input)


def h_swish(x: jax.Array, *, donate_input: bool = False) -> jax.Array:
    """Elementwise hard-swish. Accepts any shape (e.g. NCHW)."""
    orig_shape = x.shape
    total = x.size
    if total == 0:
        return x
    cfg = _chip_config()
    if total % LANES == 0:
        # Common case: lane-dense (n, 128) slab, no padding.
        x2d = x.reshape(total // LANES, LANES)
        return _h_swish_2d(x2d, cfg, donate_input).reshape(orig_shape)
    return _h_swish_flat(x.reshape(-1), cfg, donate_input).reshape(orig_shape)


def h_swish_ref(x):
    return x * (jnp.clip(x + 3.0, 0.0, 6.0) / 6.0)


if __name__ == "__main__":
    key = jax.random.PRNGKey(0)
    # NCHW, consistent with PyTorch conv-feature-map usage of h_swish.
    x = jax.random.normal(key, (2, 4, 16, 16), dtype=jnp.float32) * 4.0
    out = h_swish(x)
    jax.block_until_ready(out)
    assert out.shape == x.shape and out.dtype == x.dtype
    assert jnp.allclose(out, h_swish_ref(x), atol=1e-6, rtol=1e-6)

    # Exercise the ragged (size % 128 != 0) fallback path on a small shape.
    x2 = jax.random.normal(jax.random.PRNGKey(1), (2, 3, 7, 5), dtype=jnp.float32) * 4.0
    out2 = h_swish(x2)
    jax.block_until_ready(out2)
    assert out2.shape == x2.shape and out2.dtype == x2.dtype
    assert jnp.allclose(out2, h_swish_ref(x2), atol=1e-6, rtol=1e-6)

    print("KERNEL_OK")
</pallas_src>

<mosaic_0001>
module attributes {stable_mosaic.version = 11 : i64} {
  func.func @_h_swish_kernel(%arg0: i32, %arg1: memref<16x128xf32, #tpu.memory_space<vmem>>, %arg2: memref<16x128xf32, #tpu.memory_space<vmem>>) attributes {dimension_semantics = [#tpu.dimension_semantics<parallel>], iteration_bounds = array<i64: 1>, scalar_prefetch = 0 : i64, scratch_operands = 0 : i64, tpu.core_type = #tpu.core_type<tc>, window_params = [{transform_indices = @transform_0, window_bounds = array<i64: 16, 128>}, {transform_indices = @transform_1, window_bounds = array<i64: 16, 128>}]} {
    %c0 = arith.constant 0 : index
    %c0_0 = arith.constant 0 : index
    %0 = vector.load %arg1[%c0, %c0_0] : memref<16x128xf32, #tpu.memory_space<vmem>>, vector<16x128xf32>
    %cst = arith.constant 3.000000e+00 : f32
    %1 = vector.broadcast %cst : f32 to vector<16x128xf32>
    %2 = arith.addf %0, %1 : vector<16x128xf32>
    %cst_1 = arith.constant 0.000000e+00 : f32
    %cst_2 = arith.constant 6.000000e+00 : f32
    %3 = vector.broadcast %cst_1 : f32 to vector<16x128xf32>
    %4 = arith.maximumf %3, %2 : vector<16x128xf32>
    %5 = vector.broadcast %cst_2 : f32 to vector<16x128xf32>
    %6 = arith.minimumf %5, %4 : vector<16x128xf32>
    %cst_3 = arith.constant 0.166666672 : f32
    %7 = vector.broadcast %cst_3 : f32 to vector<16x128xf32>
    %8 = arith.mulf %6, %7 : vector<16x128xf32>
    %9 = arith.mulf %0, %8 : vector<16x128xf32>
    %c0_4 = arith.constant 0 : index
    %c0_5 = arith.constant 0 : index
    %10 = vector.load %arg2[%c0_4, %c0_5] : memref<16x128xf32, #tpu.memory_space<vmem>>, vector<16x128xf32>
    tpu.vector_store %arg2[%c0_4, %c0_5], %9 {strides = array<i32>} : memref<16x128xf32, #tpu.memory_space<vmem>>, vector<16x128xf32>,
    return
  }
  func.func @transform_0(%arg0: i32) -> (i32, i32) {
    %c0_i32 = arith.constant 0 : i32
    %c0_i32_0 = arith.constant 0 : i32
    return %arg0, %c0_i32 : i32, i32
  }
  func.func @transform_1(%arg0: i32) -> (i32, i32) {
    %c0_i32 = arith.constant 0 : i32
    %c0_i32_0 = arith.constant 0 : i32
    return %arg0, %c0_i32 : i32, i32
  }
}

</mosaic_0001>

<bundles_post_ra>
// kernel: tpu_custom_call.1
= control target key start
LH: loop header
LB: loop body
LE: loop exit
PB: predicated region body
PF: predicated region fallthrough
CT: control target
= control target key end

     0   :  { %6 = vsyncpa [#allocation3], 0  ;;  %s128_s0 = inlined_call_operand.hbm [shape: f32[16,128], index: 0, kind: input, shape index: {}]   ;;  %s129_s1 = inlined_call_operand.hbm [shape: f32[16,128], index: 1, kind: output, shape index: {}]  }
   0x1   :  { %7 = vsyncpa [#allocation4], 0  ;;  %s102_s6 = smov [#allocation2]  }
   0x2   :  { %s13_s7 = sshll.u32 %s102_s6, 4  ;;  %s14_s7 = int_to_ptr.vmem [resolvable:$true] %s13_s7 }
   0x3   :  { %s66_s8 = scalar_lea.vmem %s14_s7, 256  ;;  %p71_p1 = scmp.lt.s32.totalorder %s14_s7, %s14_s7 }
   0x4   :  { %p67_p0 = scmp.ne.s32.totalorder %s14_s7, %s66_s8  ;;  %p72_p2 = scmp.lt.s32.totalorder %s66_s8, %s66_s8 }
   0x6   :  { %p73_p3 = por %p72_p2, %p71_p1 }
   0x8   :  { %p74_p4 = pnand %p73_p3, %p67_p0 }
   0xa   :  { %77 = shalt.err (!%p74_p4)
}
   0xb   :  { %s103_s9 = smov 128   ;;  %s104_s10 = smov 8  }
   0xc   :  { %19 = dma.hbm_to_vmem [thread:$0]  %s128_s0, 256, %s14_s7, [#allocation3], %s103_s9, %s103_s9, %s104_s10  }
   0xd   :  { %98 = dma.done.wait [#allocation3], 256  }
   0xe   :  { %99 = vsyncadd [#allocation3], 4294967040  ;;  %v23_v0 = vld [vmem:[#allocation2] sm:$0xff]  ;;  %v24_v1 = vld [vmem:[#allocation2 + $0x8] sm:$0xff]  ;;  %s105_s13 = smov [#allocation5]  }
   0xf   :  { %v25_v2 = vadd.f32 3.0, %v23_v0  ;;  %v26_v3 = vadd.f32 3.0, %v24_v1  ;;  %s42_s14 = sshll.u32 %s105_s13, 4  ;;  %s43_s14 = int_to_ptr.vmem [resolvable:$true] %s42_s14 }
  0x10   :  { %s78_s0 = scalar_lea.vmem %s43_s14, 256  ;;  %p83_p6 = scmp.lt.s32.totalorder %s43_s14, %s43_s14 }
  0x11   :  { %v27_v4 = vmax.f32 %v25_v2, 0.0  ;;  %v28_v5 = vmax.f32 %v26_v3, 0.0  ;;  %p79_p5 = scmp.ne.s32.totalorder %s43_s14, %s78_s0  ;;  %p84_p7 = scmp.lt.s32.totalorder %s78_s0, %s78_s0 }
  0x13   :  { %v29_v6 = vmin.f32 %v27_v4, 6.0  ;;  %v30_v7 = vmin.f32 %v28_v5, 6.0  ;;  %p85_p8 = por %p84_p7, %p83_p6 }
  0x15   :  { %v31_v8 = vmul.f32 0.16666667, %v29_v6  ;;  %v32_v9 = vmul.f32 0.16666667, %v30_v7  ;;  %p86_p9 = pnand %p85_p8, %p79_p5 }
  0x17   :  { %v33_v10 = vmul.f32 %v31_v8, %v23_v0  ;;  %v34_v11 = vmul.f32 %v32_v9, %v24_v1 }
  0x19   :  { %35 = vst [vmem:[#allocation5] sm:$0xff] %v33_v10  ;;  %36 = vst [vmem:[#allocation5 + $0x8] sm:$0xff] %v34_v11 }
  0x1a   :  { %89 = shalt.err (!%p86_p9)
}
  0x1b   :  { %48 = dma.vmem_to_hbm [thread:$0]  %s43_s14, 256, %s129_s1, [#allocation4], %s103_s9, %s103_s9, %s104_s10  }
  0x1c   :  { %100 = dma.done.wait [#allocation4], 256  }
  0x1d   :  { %101 = vsyncadd [#allocation4], 4294967040 }
  0x1e   :  { %52 = vsyncpa [#allocation3], 1 }
  0x1f   :  { %53 = vsyncpa [#allocation4], 1 }

</bundles_post_ra>
